<compile_context>
chip_gen: v7x
topology: tpu7x:2x2x1
jax: 0.10.0
libtpu: 0.0.40
codegen_flags: <defaults>
</compile_context>

<pallas_src>
import numpy as np
import jax
import jax.numpy as jnp
from jax import lax
from jax.experimental import pallas as pl
from jax.experimental.pallas import tpu as pltpu

N_PAD_DEFAULT = 128


# --- g: function applied elementwise to each diagram point (birth, death) ---------
# TODO(synk): the original module accepts an arbitrary torch callable g; only
# elementwise jnp-compatible functionals can be compiled into the kernel (edit here).
def g_point(births, deaths):
    return deaths - births  # bar persistence


# ----------------------------------- kernel ---------------------------------------
def _diagram_loss_kernel(params_ref, dgm_ref, len_col_ref, out_ref):
    # params_ref : (B, 4) int32 in SMEM -> [i_start, j_end, n_bars, remove_zero]
    # dgm_ref    : (2, n_pad)  row 0 = births, row 1 = deaths (points on lane axis)
    # len_col_ref: (n_pad, 1)  host-precomputed bar lengths, column layout
    # out_ref    : (1, 128)    per-diagram loss broadcast over lanes
    n_pad = dgm_ref.shape[-1]
    b = pl.program_id(0)

    i_start = params_ref[b, 0].astype(jnp.float32)     # first kept rank
    j_end = params_ref[b, 1].astype(jnp.float32)       # one past last kept rank
    n_bars = params_ref[b, 2]                          # valid (non-padding) points
    rm_zero = params_ref[b, 3]                         # 1 -> drop zero-length bars

    births = dgm_ref[0:1, :]                           # (1, n_pad)
    deaths = dgm_ref[1:2, :]                           # (1, n_pad)
    lengths = deaths - births                          # (1, n_pad) row layout
    len_col = len_col_ref[...]                         # (n_pad, 1) column layout

    lane = lax.broadcasted_iota(jnp.int32, (1, n_pad), 1)    # point index (row form)
    m_col = lax.broadcasted_iota(jnp.int32, (n_pad, 1), 0)   # point index (col form)

    # eligible = real point AND (nonzero length OR remove_zero disabled)
    valid_f = (lane < n_bars).astype(jnp.float32)            # (1, n_pad) 0/1
    nz_f = (lengths != 0.0).astype(jnp.float32)              # (1, n_pad) 0/1
    keep_all = (rm_zero == 0).astype(jnp.float32)            # scalar 0/1
    elig_f = valid_f * jnp.maximum(nz_f, keep_all)           # (1, n_pad) 0/1
    eligible = elig_f > 0.5

    # before[m, k] = bar m sorts strictly before bar k in descending-length,
    # index-stable order.  Implicit (n_pad,1) x (1,n_pad) broadcast: no transpose,
    # no materialized full-size iotas.
    before = (len_col > lengths) | ((len_col == lengths) & (m_col < lane))

    # rank[k] = number of eligible bars sorting before bar k.
    # Column sum of the (n_pad, n_pad) matrix done on the MXU (f32 dot); the
    # eligibility mask is folded into the LHS so padding / removed bars never count.
    lhs = jnp.broadcast_to(elig_f, (8, n_pad))               # cheap sublane broadcast
    rank = jnp.dot(lhs, before.astype(jnp.float32),
                   preferred_element_type=jnp.float32)[0:1, :]   # (1, n_pad)

    # keep eligible bars whose rank lies in [i_start, j_end)
    sel = eligible & (rank >= i_start) & (rank < j_end)

    g_vals = g_point(births, deaths)                         # (1, n_pad)
    loss = jnp.sum(sel.astype(jnp.float32) * g_vals, axis=1, keepdims=True)  # (1, 1)
    out_ref[...] = jnp.broadcast_to(loss, out_ref.shape)     # lane-dense store


# ------------------------------- jitted launcher -----------------------------------
@jax.jit
def _diagram_loss_pallas(dgm_padded, params):
    """dgm_padded: (B, n_pad, 2) f32 zero-padded diagrams; params: (B, 4) int32."""
    B, n_pad, _ = dgm_padded.shape

    # Layout plumbing stays inside the same jit as the kernel (tiny XLA ops).
    packed = jnp.transpose(dgm_padded, (0, 2, 1))                     # (B, 2, n_pad)
    len_col = dgm_padded[:, :, 1:2] - dgm_padded[:, :, 0:1]           # (B, n_pad, 1)

    cost = pl.CostEstimate(
        flops=B * (2 * 8 * n_pad * n_pad + 6 * n_pad * n_pad),
        transcendentals=0,
        bytes_accessed=B * (3 * n_pad + 128 + 4) * 4,
    )

    out = pl.pallas_call(
        _diagram_loss_kernel,
        out_shape=jax.ShapeDtypeStruct((B, 1, 128), jnp.float32),
        grid_spec=pltpu.PrefetchScalarGridSpec(
            num_scalar_prefetch=1,                 # params -> SMEM, read per diagram
            grid=(B,),
            in_specs=[
                pl.BlockSpec((None, 2, n_pad), lambda b, p: (b, 0, 0)),
                pl.BlockSpec((None, n_pad, 1), lambda b, p: (b, 0, 0)),
            ],
            out_specs=pl.BlockSpec((None, 1, 128), lambda b, p: (b, 0, 0)),
        ),
        compiler_params=pltpu.CompilerParams(
            dimension_semantics=("parallel",),     # split diagrams across v7x TCs
        ),
        cost_estimate=cost,
    )(params, packed, len_col)
    return out[:, 0, 0]                                                # (B,)


# --------------------------------- host wrappers -----------------------------------
def diagram_loss_batch(diagrams, specs, n_pad=N_PAD_DEFAULT):
    """Evaluate many DiagramLoss heads in ONE pallas_call.

    diagrams: list of (N_b, 2) arrays (births, deaths)
    specs:    list of (i, j, remove_zero) per diagram (module semantics: 1-based i)
    """
    assert len(diagrams) == len(specs)
    padded, params = [], []
    for dgm, (i, j, remove_zero) in zip(diagrams, specs):
        dgm = jnp.asarray(dgm, jnp.float32)
        n = dgm.shape[0]
        assert n <= n_pad, f"diagram with {n} points exceeds n_pad={n_pad}"
        padded.append(jnp.concatenate(
            [dgm, jnp.zeros((n_pad - n, 2), jnp.float32)], axis=0))
        params.append([int(i) - 1, int(min(j, n_pad)), int(n), 1 if remove_zero else 0])
    dgm_padded = jnp.stack(padded, axis=0)                 # (B, n_pad, 2)
    params = jnp.asarray(params, jnp.int32)                # (B, 4)
    return _diagram_loss_pallas(dgm_padded, params)


def diagram_loss(dgminfo, dim, i=1, j=np.inf, remove_zero=True, n_pad=N_PAD_DEFAULT):
    """Module-style API: single (dgms, issublevel) input -> scalar loss."""
    dgms, _issublevel = dgminfo
    out = diagram_loss_batch([dgms[dim]], [(i, j, remove_zero)], n_pad=n_pad)
    return out[0]


# ----------------------- pure-NumPy reference (for checking) -----------------------
def reference_loss(dgm_np, i=1, j=np.inf, remove_zero=True):
    dgm_np = np.asarray(dgm_np, dtype=np.float32)
    if remove_zero:
        dgm_np = dgm_np[dgm_np[:, 0] != dgm_np[:, 1]]
    lengths = dgm_np[:, 1] - dgm_np[:, 0]
    order = np.argsort(-lengths, kind="stable")
    stop = int(min(dgm_np.shape[0], j))
    sel = dgm_np[order[i - 1:stop]]
    if sel.shape[0] == 0:
        return np.float32(0.0)
    return np.float32(sum(float(p[1] - p[0]) for p in sel))


if __name__ == "__main__":
    key = jax.random.PRNGKey(0)
    k1, k2, k3, k4 = jax.random.split(key, 4)

    # Synthetic persistence diagrams: dgms[0] (H0) and dgms[1] (H1).
    n0, n1 = 12, 10
    b0 = jax.random.uniform(k1, (n0,), jnp.float32)
    l0 = jax.random.uniform(k2, (n0,), jnp.float32)
    dgm0 = jnp.stack([b0, b0 + l0], axis=1)                 # (12, 2)

    b1 = jax.random.uniform(k3, (n1,), jnp.float32)
    l1 = jax.random.uniform(k4, (n1,), jnp.float32)
    l1 = l1.at[jnp.array([2, 7])].set(0.0)                  # two zero-length bars
    dgm1 = jnp.stack([b1, b1 + l1], axis=1)                 # (10, 2)

    dgminfo = ([dgm0, dgm1], True)                          # (dgms, issublevel)

    # Three "loss heads" with different (dim, i, j, remove_zero) evaluated in a
    # single batched pallas_call (no recompiles between configurations).
    heads = [
        dict(dim=0, i=1, j=np.inf, remove_zero=True),
        dict(dim=1, i=2, j=6,      remove_zero=True),
        dict(dim=1, i=1, j=np.inf, remove_zero=False),
    ]
    dgms, _ = dgminfo
    diagrams = [dgms[h["dim"]] for h in heads]
    specs = [(h["i"], h["j"], h["remove_zero"]) for h in heads]

    losses = jax.block_until_ready(diagram_loss_batch(diagrams, specs))

    for h, loss in zip(heads, np.asarray(losses)):
        ref = reference_loss(np.asarray(dgms[h["dim"]]), i=h["i"], j=h["j"],
                             remove_zero=h["remove_zero"])
        assert np.allclose(float(loss), float(ref), rtol=1e-4, atol=1e-5), \
            (h, float(loss), float(ref))

    # Module-style single-diagram API (batch of one) still works.
    single = jax.block_until_ready(diagram_loss(dgminfo, dim=1, i=2, j=6))
    ref1 = reference_loss(np.asarray(dgm1), i=2, j=6, remove_zero=True)
    assert np.allclose(float(single), float(ref1), rtol=1e-4, atol=1e-5), \
        (float(single), float(ref1))

    print("KERNEL_OK")
</pallas_src>

<mosaic_0001>
module attributes {stable_mosaic.version = 11 : i64} {
  func.func @_diagram_loss_kernel(%arg0: i32, %arg1: memref<3x4xi32, #tpu.memory_space<smem>>, %arg2: memref<1x2x128xf32, #tpu.memory_space<vmem>>, %arg3: memref<1x128x1xf32, #tpu.memory_space<vmem>>, %arg4: memref<1x1x128xf32, #tpu.memory_space<vmem>>) attributes {dimension_semantics = [#tpu.dimension_semantics<parallel>], iteration_bounds = array<i64: 3>, scalar_prefetch = 1 : i64, scratch_operands = 0 : i64, tpu.core_type = #tpu.core_type<tc>, window_params = [{transform_indices = @transform_0, window_bounds = array<i64: 1, 2, 128>}, {transform_indices = @transform_1, window_bounds = array<i64: 1, 128, 1>}, {transform_indices = @transform_2, window_bounds = array<i64: 1, 1, 128>}]} {
    %0 = arith.index_cast %arg0 : i32 to index
    %c0 = arith.constant 0 : index
    %1 = memref.load %arg1[%0, %c0] : memref<3x4xi32, #tpu.memory_space<smem>>
    %2 = arith.sitofp %1 : i32 to f32
    %3 = arith.index_cast %arg0 : i32 to index
    %c1 = arith.constant 1 : index
    %4 = memref.load %arg1[%3, %c1] : memref<3x4xi32, #tpu.memory_space<smem>>
    %5 = arith.sitofp %4 : i32 to f32
    %6 = arith.index_cast %arg0 : i32 to index
    %c2 = arith.constant 2 : index
    %7 = memref.load %arg1[%6, %c2] : memref<3x4xi32, #tpu.memory_space<smem>>
    %8 = arith.index_cast %arg0 : i32 to index
    %c3 = arith.constant 3 : index
    %9 = memref.load %arg1[%8, %c3] : memref<3x4xi32, #tpu.memory_space<smem>>
    %c0_0 = arith.constant 0 : index
    %c0_1 = arith.constant 0 : index
    %c0_2 = arith.constant 0 : index
    %10 = vector.load %arg2[%c0_0, %c0_1, %c0_2] : memref<1x2x128xf32, #tpu.memory_space<vmem>>, vector<1x1x128xf32>
    %11 = vector.shape_cast %10 : vector<1x1x128xf32> to vector<1x128xf32>
    %c0_3 = arith.constant 0 : index
    %c1_4 = arith.constant 1 : index
    %c0_5 = arith.constant 0 : index
    %12 = vector.load %arg2[%c0_3, %c1_4, %c0_5] : memref<1x2x128xf32, #tpu.memory_space<vmem>>, vector<1x1x128xf32>
    %13 = vector.shape_cast %12 : vector<1x1x128xf32> to vector<1x128xf32>
    %14 = arith.subf %13, %11 : vector<1x128xf32>
    %c0_6 = arith.constant 0 : index
    %c0_7 = arith.constant 0 : index
    %c0_8 = arith.constant 0 : index
    %15 = vector.load %arg3[%c0_6, %c0_7, %c0_8] : memref<1x128x1xf32, #tpu.memory_space<vmem>>, vector<1x128x1xf32>
    %16 = vector.shape_cast %15 : vector<1x128x1xf32> to vector<128x1xf32>
    %17 = tpu.iota {dimensions = array<i32: 1>} : vector<1x128xi32>
    %18 = tpu.iota {dimensions = array<i32: 0>} : vector<128x1xi32>
    %19 = vector.broadcast %7 : i32 to vector<1x128xi32>
    %20 = arith.cmpi slt, %17, %19 : vector<1x128xi32>
    %21 = arith.extui %20 : vector<1x128xi1> to vector<1x128xi32>
    %22 = arith.sitofp %21 : vector<1x128xi32> to vector<1x128xf32>
    %cst = arith.constant 0.000000e+00 : f32
    %23 = vector.broadcast %cst : f32 to vector<1x128xf32>
    %24 = arith.cmpf one, %14, %23 : vector<1x128xf32>
    %25 = arith.extui %24 : vector<1x128xi1> to vector<1x128xi32>
    %26 = arith.sitofp %25 : vector<1x128xi32> to vector<1x128xf32>
    %c0_i32 = arith.constant 0 : i32
    %27 = arith.cmpi eq, %9, %c0_i32 : i32
    %28 = arith.extui %27 : i1 to i32
    %29 = arith.sitofp %28 : i32 to f32
    %30 = vector.broadcast %29 : f32 to vector<1x128xf32>
    %31 = arith.maximumf %26, %30 : vector<1x128xf32>
    %32 = arith.mulf %22, %31 : vector<1x128xf32>
    %cst_9 = arith.constant 5.000000e-01 : f32
    %33 = vector.broadcast %cst_9 : f32 to vector<1x128xf32>
    %34 = arith.cmpf ogt, %32, %33 : vector<1x128xf32>
    %35 = vector.broadcast %16 : vector<128x1xf32> to vector<128x128xf32>
    %36 = vector.broadcast %14 : vector<1x128xf32> to vector<128x128xf32>
    %37 = arith.cmpf ogt, %35, %36 : vector<128x128xf32>
    %38 = vector.broadcast %16 : vector<128x1xf32> to vector<128x128xf32>
    %39 = vector.broadcast %14 : vector<1x128xf32> to vector<128x128xf32>
    %40 = arith.cmpf oeq, %38, %39 : vector<128x128xf32>
    %41 = vector.broadcast %18 : vector<128x1xi32> to vector<128x128xi32>
    %42 = vector.broadcast %17 : vector<1x128xi32> to vector<128x128xi32>
    %43 = arith.cmpi slt, %41, %42 : vector<128x128xi32>
    %44 = arith.andi %40, %43 : vector<128x128xi1>
    %45 = arith.ori %37, %44 : vector<128x128xi1>
    %46 = vector.shape_cast %32 : vector<1x128xf32> to vector<1x128xf32>
    %47 = vector.broadcast %46 : vector<1x128xf32> to vector<8x128xf32>
    %48 = arith.extui %45 : vector<128x128xi1> to vector<128x128xi32>
    %49 = arith.sitofp %48 : vector<128x128xi32> to vector<128x128xf32>
    %cst_10 = arith.constant dense<0.000000e+00> : vector<8x128xf32>
    %50 = tpu.matmul %47, %49, %cst_10 {dimension_numbers = #tpu.dot_dimension_numbers<[1], [0], [0], [1], [0, 0, 1, 1], [], []>} : vector<8x128xf32>, vector<128x128xf32>, vector<8x128xf32> -> vector<8x128xf32>
    %51 = vector.extract_strided_slice %50 {offsets = [0, 0], sizes = [1, 128], strides = [1, 1]} : vector<8x128xf32> to vector<1x128xf32>
    %52 = vector.broadcast %2 : f32 to vector<1x128xf32>
    %53 = arith.cmpf oge, %51, %52 : vector<1x128xf32>
    %54 = arith.andi %34, %53 : vector<1x128xi1>
    %55 = vector.broadcast %5 : f32 to vector<1x128xf32>
    %56 = arith.cmpf olt, %51, %55 : vector<1x128xf32>
    %57 = arith.andi %54, %56 : vector<1x128xi1>
    %58 = arith.subf %13, %11 : vector<1x128xf32>
    %59 = arith.extui %57 : vector<1x128xi1> to vector<1x128xi32>
    %60 = arith.sitofp %59 : vector<1x128xi32> to vector<1x128xf32>
    %61 = arith.mulf %60, %58 : vector<1x128xf32>
    %cst_11 = arith.constant dense<0.000000e+00> : vector<1xf32>
    %62 = vector.multi_reduction <add>, %61, %cst_11 [1] : vector<1x128xf32> to vector<1xf32>
    %63 = vector.shape_cast %62 : vector<1xf32> to vector<1x1xf32>
    %64 = vector.shape_cast %63 : vector<1x1xf32> to vector<1x1xf32>
    %65 = vector.broadcast %64 : vector<1x1xf32> to vector<1x128xf32>
    %c0_12 = arith.constant 0 : index
    %c0_13 = arith.constant 0 : index
    %c0_14 = arith.constant 0 : index
    %66 = vector.load %arg4[%c0_12, %c0_13, %c0_14] : memref<1x1x128xf32, #tpu.memory_space<vmem>>, vector<1x1x128xf32>
    %67 = vector.shape_cast %66 : vector<1x1x128xf32> to vector<1x128xf32>
    %68 = vector.shape_cast %65 : vector<1x128xf32> to vector<1x1x128xf32>
    tpu.vector_store %arg4[%c0_12, %c0_13, %c0_14], %68 {strides = array<i32>} : memref<1x1x128xf32, #tpu.memory_space<vmem>>, vector<1x1x128xf32>,
    return
  }
  func.func @transform_0(%arg0: i32, %arg1: memref<3x4xi32, #tpu.memory_space<smem>>) -> (i32, i32, i32) {
    %c0_i32 = arith.constant 0 : i32
    %c0_i32_0 = arith.constant 0 : i32
    %c0_i32_1 = arith.constant 0 : i32
    return %arg0, %c0_i32, %c0_i32_0 : i32, i32, i32
  }
  func.func @transform_1(%arg0: i32, %arg1: memref<3x4xi32, #tpu.memory_space<smem>>) -> (i32, i32, i32) {
    %c0_i32 = arith.constant 0 : i32
    %c0_i32_0 = arith.constant 0 : i32
    %c0_i32_1 = arith.constant 0 : i32
    return %arg0, %c0_i32, %c0_i32_0 : i32, i32, i32
  }
  func.func @transform_2(%arg0: i32, %arg1: memref<3x4xi32, #tpu.memory_space<smem>>) -> (i32, i32, i32) {
    %c0_i32 = arith.constant 0 : i32
    %c0_i32_0 = arith.constant 0 : i32
    %c0_i32_1 = arith.constant 0 : i32
    return %arg0, %c0_i32, %c0_i32_0 : i32, i32, i32
  }
}

</mosaic_0001>

<bundles_post_ra>
// kernel: _diagram_loss_pallas.1
= control target key start
LH: loop header
LB: loop body
LE: loop exit
PB: predicated region body
PF: predicated region fallthrough
CT: control target
= control target key end

     0   :  { %s1003_s0 = inlined_call_operand.vmem [shape: s32[3,4], index: 0, kind: input, shape index: {}]   ;;  %s1004_s1 = inlined_call_operand.vmem [shape: f32[3,2,128], index: 1, kind: input, shape index: {}]   ;;  %s1005_s2 = inlined_call_operand.vmem [shape: f32[3,128,1], index: 2, kind: input, shape index: {}]   ;;  %s1006_s3 = inlined_call_operand.vmem [shape: f32[3,1,128], index: 3, kind: output, shape index: {}]  }
   0x1   :  { %s8_s14 = sshll.u32 %s1003_s0, 4  ;;  %s9_s14 = int_to_ptr.vmem [resolvable:$true] %s8_s14 }
   0x2   :  { %s708_s15 = scalar_lea.vmem %s9_s14, 64  ;;  %p713_p1 = scmp.lt.s32.totalorder %s9_s14, %s9_s14 }
   0x3   :  { %p709_p0 = scmp.ne.s32.totalorder %s9_s14, %s708_s15  ;;  %p714_p2 = scmp.lt.s32.totalorder %s708_s15, %s708_s15 }
   0x5   :  { %p715_p3 = por %p714_p2, %p713_p1 }
   0x7   :  { %p716_p4 = pnand %p715_p3, %p709_p0 }
   0x9   :  { %719 = shalt.err (!%p716_p4)  }
   0xa   :  { %s730_s16 = smov [#allocation3]  }
   0xb   :  { %11 = dma.vmem_to_smem %s9_s14, 64, %s730_s16, [#allocation2] }
   0xc   :  { %724 = dma.done.wait [#allocation2], 64 }
   0xd   :  { %725 = vsyncadd [#allocation2], 4294967232 }
   0xe   :  { %13 = sfence }
   0xf   :  { %s759_s17 = smov 0  }
  0x10 LB: > { %s765_s0 = sadd.s32 4294967295, %s728_s17   ;;  %p573_p5 = scmp.ge.s32.totalorder %s728_s17, 1  ;;  %s728_s17 = sphi %s759_s17, %s19_s17  }
  0x11   : > { %p128_p6 = scmp.lt.s32.totalorder %s728_s17, 4 }
  0x13   : > { %p129_p7 = pnand %p573_p5, %p128_p6 }
  0x14   : > { %p152_p8 = scmp.lt.s32.totalorder (!%p129_p7), %s765_s0, 2  ;;  %v731_v0 = vmov (!%p129_p7), 0   ;;  %v732_v7 = vmov (!%p129_p7), 0.0|0.0   ;;  %vm733_vm0 = vmmov (!%p129_p7), 0   ;;  %v734_v18 = vmov (!%p129_p7), 0.0   ;;  %s841_s27 = sshll.u32 (!%p129_p7), %s765_s0, 7 }
  0x15   : > { %132 = sbr.rel (%p129_p7) target bundleno = 569 (0x239), region = 28  ;;  %707 = vset.pattern.permute.xlu1 (!%p129_p7), %v731_v0  ;;  %706 = vset.pattern.permute.xlu0 (!%p129_p7), %v731_v0  ;;  %v193_v19 = vlaneseq (!%p129_p7)  ;;  %v1007_v36 = vmov (!%p129_p7), 0  ;;  %s172_s28 = sadd.s32 (!%p129_p7), 3, %s841_s27  ;;  %v735_v44 = vmov (!%p129_p7), 1.0|1.0  }
  0x16   : > { %668 = vmatprep.subr.bf16.mxu0 (!%p129_p7), %v732_v7  ;;  %665 = vmatprep.mubr.msk.f32.mxu0 (!%p129_p7), %vm733_vm0, %v734_v18  ;;  %s865_s29 = sld [smem:[#allocation3 + %s172_s28]] (!%p129_p7)  ;;  %s170_s30 = sadd.s32 (!%p129_p7), 2, %s841_s27 }
  0x17   : > { %v801_v20 = vshrl.u32 (!%p129_p7), %v193_v19, 7  ;;  %v812_v27 = vand.u32 (!%p129_p7), 127, %v193_v19  ;;  %s915_s4 = sld [smem:[#allocation3 + %s170_s30]] (!%p129_p7)  ;;  %s167_s7 = sadd.s32 (!%p129_p7), 1, %s841_s27 }
  0x18   : > { %s165_s8 = sld [smem:[#allocation3 + %s841_s27]] (!%p129_p7) }
  0x19   : > { %v308_v23 = vsub.s32 (!%p129_p7), 0, %v801_v20  ;;  %v198_v25 = vadd.s32 (!%p129_p7), 16, %v801_v20  ;;  %v197_v30 = vadd.s32 (!%p129_p7), 8, %v801_v20  ;;  %vm342_vm3 = vcmp.lt.s32.totalorder (!%p129_p7), %v801_v20, %v812_v27  ;;  %s168_s9 = sld [smem:[#allocation3 + %s167_s7]] (!%p129_p7) }
  0x1a   : > { %v199_v32 = vadd.s32 (!%p129_p7), 24, %v801_v20  ;;  %v201_v34 = vadd.s32 (!%p129_p7), 40, %v801_v20  ;;  %v200_v38 = vadd.s32 (!%p129_p7), 32, %v801_v20  ;;  %v203_v40 = vadd.s32 (!%p129_p7), 56, %v801_v20 }
  0x1b   : > { %vm344_vm1 = vcmp.lt.s32.totalorder (!%p129_p7), %v198_v25, %v812_v27  ;;  %vm343_vm5 = vcmp.lt.s32.totalorder (!%p129_p7), %v197_v30, %v812_v27  ;;  %v202_v45 = vadd.s32 (!%p129_p7), 48, %v801_v20  ;;  %v205_v47 = vadd.s32 (!%p129_p7), 72, %v801_v20 }
  0x1c   : > { %s771_s18 = scalar_select %p152_p8, %s765_s0, 2  ;;  %vm345_vm14 = vcmp.lt.s32.totalorder %v199_v32, %v812_v27  ;;  %vm347_vm0 = vcmp.lt.s32.totalorder %v201_v34, %v812_v27  ;;  %v204_v51 = vadd.s32 64, %v801_v20  ;;  %v207_v54 = vadd.s32 88, %v801_v20 }
  0x1d   : > { %p219_p9 = scmp.eq.s32.totalorder %s865_s29, 0  ;;  %v206_v57 = vadd.s32 80, %v801_v20  ;;  %v209_v59 = vadd.s32 104, %v801_v20  ;;  %v208_v63 = vadd.s32 96, %v801_v20 }
  0x1e   : > { %s615_s19 = sshll.u32 %s771_s18, 7  ;;  %s574_s23 = sshll.u32 %s771_s18, 1 }
  0x1f   : > { %s777_s22 = scalar_lea.vmem %s1005_s2, %s615_s19  ;;  %s155_s26 = scalar_lea.vmem %s1004_s1, %s574_s23 }
  0x20   : > { %v179_v1 = vld [vmem:[%s777_s22 + $0x10] sm:$0xff]  ;;  %v177_v2 = vld [vmem:[%s777_s22] sm:$0xff]  ;;  %v180_v3 = vld [vmem:[%s777_s22 + $0x18] sm:$0xff]  ;;  %s923_s5 = scalar_select %p219_p9, 1, 0 }
  0x21   : > { %238 = vperm.xlu1 %707, %v179_v1   ;;  %228 = vperm.xlu0 %706, %v177_v2   ;;  %v178_v4 = vld [vmem:[%s777_s22 + $0x8] sm:$0xff]  ;;  %v181_v6 = vld [vmem:[%s777_s22 + $0x20] sm:$0xff]  ;;  %v184_v8 = vld [vmem:[%s777_s22 + $0x38] sm:$0xff]  ;;  %v211_v1 = vadd.s32 120, %v801_v20  ;;  %s166_s10 = scvt.s32.f32 %s165_s8  ;;  %s169_s11 = scvt.s32.f32 %s168_s9 }
  0x22   : > { %v182_v5 = vld [vmem:[%s777_s22 + $0x28] sm:$0xff]  ;;  %v183_v9 = vld [vmem:[%s777_s22 + $0x30] sm:$0xff]  ;;  %v185_v11 = vld [vmem:[%s777_s22 + $0x40] sm:$0xff]  ;;  %s221_s6 = scvt.s32.f32 %s923_s5  ;;  %s163_s14 = scalar_lea.vmem %s1006_s3, %s771_s18 }
  0x23   : > { %v186_v10 = vld [vmem:[%s777_s22 + $0x48] sm:$0xff]  ;;  %v188_v12 = vld [vmem:[%s777_s22 + $0x58] sm:$0xff]  ;;  %v187_v13 = vld [vmem:[%s777_s22 + $0x50] sm:$0xff] }
  0x24   : > { %v190_v14 = vld [vmem:[%s777_s22 + $0x68] sm:$0xff]  ;;  %v189_v15 = vld [vmem:[%s777_s22 + $0x60] sm:$0xff]  ;;  %v192_v16 = vld [vmem:[%s777_s22 + $0x78] sm:$0xff] }
  0x25   : > { %243 = vperm.xlu1 %707, %v180_v3   ;;  %233 = vperm.xlu0 %706, %v178_v4   ;;  %v191_v17 = vld [vmem:[%s777_s22 + $0x70] sm:$0xff]  ;;  %v174_v21 = vld [vmem:[%s155_s26] sm:$0x1]  ;;  %v175_v22 = vld [vmem:[%s155_s26 + $0x1] sm:$0x1]  ;;  %v210_v3 = vadd.s32 112, %v801_v20  ;;  %v212_v4 = vstv %s915_s4 }
  0x26   : > { %v804_v24 = vsub.f32 %v175_v22, %v174_v21 }
  0x28   : > { %v810_v26 = vrot.slane %v804_v24, %v308_v23 }
  0x29   : > { %253 = vperm.xlu1 %707, %v182_v5   ;;  %248 = vperm.xlu0 %706, %v181_v6  }
  0x2d   : > { %263 = vperm.xlu1 %707, %v184_v8   ;;  %258 = vperm.xlu0 %706, %v183_v9  }
  0x31   : > { %273 = vperm.xlu1 %707, %v186_v10   ;;  %268 = vperm.xlu0 %706, %v185_v11   ;;  %v222_v10 = vstv %s221_s6 }
  0x35   : > { %283 = vperm.xlu1 %707, %v188_v12   ;;  %278 = vperm.xlu0 %706, %v187_v13  }
  0x39   : > { %293 = vperm.xlu1 %707, %v190_v14   ;;  %288 = vperm.xlu0 %706, %v189_v15   ;;  %v496_v15 = vstv %s166_s10 }
  0x3d   : > { %303 = vperm.xlu1 %707, %v192_v16   ;;  %298 = vperm.xlu0 %706, %v191_v17   ;;  %v499_v16 = vstv %s169_s11 }
  0xa0   : > { %v239_v28 = vpop.permute.xlu1 %238  ;;  %v229_v29 = vpop.permute.xlu0 %228 }
  0xa1   : > { %vm328_vm2 = vcmp.eq.f32.partialorder %v239_v28, %v810_v26  ;;  %vm326_vm4 = vcmp.eq.f32.partialorder %v229_v29, %v810_v26  ;;  %vm312_vm6 = vcmp.gt.f32.partialorder %v239_v28, %v810_v26  ;;  %vm310_vm9 = vcmp.gt.f32.partialorder %v229_v29, %v810_v26 }
  0xa2   : > { %vm360_vm7 = vmand %vm328_vm2, %vm344_vm1 }
  0xa3   : > { %vm358_vm10 = vmand %vm326_vm4, %vm342_vm3 }
  0xa4   : > { %v244_v31 = vpop.permute.xlu1 %243  ;;  %v234_v33 = vpop.permute.xlu0 %233  ;;  %vm827_vm13 = vmor %vm312_vm6, %vm360_vm7 }
  0xa5   : > { %vm327_vm8 = vcmp.eq.f32.partialorder %v234_v33, %v810_v26  ;;  %vm311_vm11 = vcmp.gt.f32.partialorder %v234_v33, %v810_v26  ;;  %v1008_v36 = vsel %vm827_vm13, 4294967295, %v1007_v36  ;;  %vm329_vm15 = vcmp.eq.f32.partialorder %v244_v31, %v810_v26  ;;  %vm836_vm2 = vmor %vm310_vm9, %vm358_vm10 }
  0xa6   : > { %vm359_vm12 = vmand %vm327_vm8, %vm343_vm5  ;;  %vm313_vm4 = vcmp.gt.f32.partialorder %v244_v31, %v810_v26  ;;  %vm346_vm8 = vcmp.lt.s32.totalorder %v200_v38, %v812_v27 }
  0xa7   : > { %vm375_vm3 = vmor %vm311_vm11, %vm359_vm12  ;;  %vm349_vm11 = vcmp.lt.s32.totalorder %v203_v40, %v812_v27 }
  0xa8   : > { %v254_v35 = vpop.permute.xlu1 %253  ;;  %v249_v37 = vpop.permute.xlu0 %248  ;;  %vm361_vm5 = vmand %vm329_vm15, %vm345_vm14 }
  0xa9   : > { %vm331_vm1 = vcmp.eq.f32.partialorder %v254_v35, %v810_v26  ;;  %vm315_vm6 = vcmp.gt.f32.partialorder %v254_v35, %v810_v26  ;;  %vm330_vm9 = vcmp.eq.f32.partialorder %v249_v37, %v810_v26  ;;  %vm669_vm10 = vmpackc.low %vm375_vm3, %vm836_vm2  ;;  %vm314_vm15 = vcmp.gt.f32.partialorder %v249_v37, %v810_v26 }
  0xaa   : > { %vm363_vm7 = vmand %vm331_vm1, %vm347_vm0  ;;  %670 = vmatpush3.bf16.msk.msra.mxu0 %vm669_vm10, %v735_v44  ;;  %vm348_vm3 = vcmp.lt.s32.totalorder %v202_v45, %v812_v27 }
  0xab   : > { %vm851_vm13 = vmor %vm313_vm4, %vm361_vm5  ;;  %671 = vmatprep.subr.bf16.mxu0 %v732_v7  ;;  %vm1015_vm5 = vnez %v1008_v36 }
  0xac   : > { %v264_v41 = vpop.permute.xlu1 %263  ;;  %v259_v42 = vpop.permute.xlu0 %258  ;;  %vm859_vm14 = vmor %vm315_vm6, %vm363_vm7 }
  0xad   : > { %vm333_vm12 = vcmp.eq.f32.partialorder %v264_v41, %v810_v26  ;;  %vm362_vm0 = vmand %vm330_vm9, %vm346_vm8  ;;  %vm317_vm1 = vcmp.gt.f32.partialorder %v264_v41, %v810_v26  ;;  %vm332_vm4 = vcmp.eq.f32.partialorder %v259_v42, %v810_v26  ;;  %vm351_vm8 = vcmp.lt.s32.totalorder %v205_v47, %v812_v27 }
  0xae   : > { %vm365_vm2 = vmand %vm333_vm12, %vm349_vm11 }
  0xaf   : > { %vm672_vm6 = vmpackc.low %vm851_vm13, %vm1015_vm5  ;;  %vm316_vm13 = vcmp.gt.f32.partialorder %v259_v42, %v810_v26 }
  0xb0   : > { %v274_v48 = vpop.permute.xlu1 %273  ;;  %v269_v49 = vpop.permute.xlu0 %268  ;;  %vm877_vm7 = vmor %vm314_vm15, %vm362_vm0  ;;  %673 = vmatpush3.bf16.msk.msra.mxu0 %vm672_vm6, %v735_v44  ;;  %vm350_vm0 = vcmp.lt.s32.totalorder %v204_v51, %v812_v27 }
  0xb1   : > { %vm335_vm9 = vcmp.eq.f32.partialorder %v274_v48, %v810_v26  ;;  %vm885_vm10 = vmor %vm317_vm1, %vm365_vm2  ;;  %674 = vmatprep.subr.bf16.mxu0 %v732_v7  ;;  %vm319_vm12 = vcmp.gt.f32.partialorder %v274_v48, %v810_v26  ;;  %vm334_vm5 = vcmp.eq.f32.partialorder %v269_v49, %v810_v26 }
  0xb2   : > { %vm364_vm11 = vmand %vm332_vm4, %vm348_vm3  ;;  %vm353_vm3 = vcmp.lt.s32.totalorder %v207_v54, %v812_v27 }
  0xb3   : > { %vm367_vm15 = vmand %vm335_vm9, %vm351_vm8 }
  0xb4   : > { %v284_v52 = vpop.permute.xlu1 %283  ;;  %v279_v55 = vpop.permute.xlu0 %278  ;;  %vm675_vm1 = vmpackc.low %vm859_vm14, %vm877_vm7  ;;  %vm318_vm14 = vcmp.gt.f32.partialorder %v269_v49, %v810_v26 }
  0xb5   : > { %vm901_vm2 = vmor %vm316_vm13, %vm364_vm11  ;;  %676 = vmatpush3.bf16.msk.msra.mxu0 %vm675_vm1, %v735_v44  ;;  %vm337_vm4 = vcmp.eq.f32.partialorder %v284_v52, %v810_v26  ;;  %vm321_vm8 = vcmp.gt.f32.partialorder %v284_v52, %v810_v26  ;;  %vm352_vm13 = vcmp.lt.s32.totalorder %v206_v57, %v812_v27  ;;  %vm336_vm11 = vcmp.eq.f32.partialorder %v279_v55, %v810_v26 }
  0xb6   : > { %vm909_vm6 = vmor %vm319_vm12, %vm367_vm15  ;;  %677 = vmatprep.subr.bf16.mxu0 %v732_v7 }
  0xb7   : > { %vm366_vm7 = vmand %vm334_vm5, %vm350_vm0  ;;  %vm355_vm0 = vcmp.lt.s32.totalorder %v209_v59, %v812_v27 }
  0xb8   : > { %v294_v60 = vpop.permute.xlu1 %293  ;;  %vm369_vm9 = vmand %vm337_vm4, %vm353_vm3  ;;  %v289_v61 = vpop.permute.xlu0 %288 }
  0xb9   : > { %vm678_vm12 = vmpackc.low %vm885_vm10, %vm901_vm2  ;;  %vm339_vm5 = vcmp.eq.f32.partialorder %v294_v60, %v810_v26  ;;  %vm320_vm10 = vcmp.gt.f32.partialorder %v279_v55, %v810_v26  ;;  %vm323_vm3 = vcmp.gt.f32.partialorder %v294_v60, %v810_v26 }
  0xba   : > { %vm931_vm15 = vmor %vm318_vm14, %vm366_vm7  ;;  %679 = vmatpush3.bf16.msk.msra.mxu0 %vm678_vm12, %v735_v44  ;;  %vm216_vm14 = vcmp.ne.f32.partialorder %v804_v24, 0.0  ;;  %vm354_vm7 = vcmp.lt.s32.totalorder %v208_v63, %v812_v27 }
  0xbb   : > { %vm939_vm1 = vmor %vm321_vm8, %vm369_vm9  ;;  %680 = vmatprep.subr.bf16.mxu0 %v732_v7  ;;  %vm338_vm8 = vcmp.eq.f32.partialorder %v289_v61, %v810_v26  ;;  %v579_v9 = vsel %vm216_vm14, 1.0, %v734_v18 }
  0xbc   : > { %vm368_vm2 = vmand %vm336_vm11, %vm352_vm13  ;;  %v304_v2 = vpop.permute.xlu1 %303  ;;  %vm357_vm11 = vcmp.lt.s32.totalorder %v211_v1, %v812_v27  ;;  %v299_v6 = vpop.permute.xlu0 %298  ;;  %v223_v11 = vmax.f32 %v579_v9, %v222_v10 }
  0xbd   : > { %vm371_vm4 = vmand %vm339_vm5, %vm355_vm0  ;;  %vm341_vm12 = vcmp.eq.f32.partialorder %v304_v2, %v810_v26  ;;  %vm213_vm5 = vcmp.lt.s32.totalorder %v812_v27, %v212_v4 }
  0xbe   : > { %vm681_vm9 = vmpackc.low %vm909_vm6, %vm931_vm15  ;;  %vm322_vm6 = vcmp.gt.f32.partialorder %v289_v61, %v810_v26  ;;  %v578_v12 = vsel %vm213_vm5, 1.0, %v734_v18 }
  0xbf   : > { %vm957_vm13 = vmor %vm320_vm10, %vm368_vm2  ;;  %682 = vmatpush3.bf16.msk.msra.mxu0 %vm681_vm9, %v735_v44  ;;  %vm356_vm2 = vcmp.lt.s32.totalorder %v210_v3, %v812_v27  ;;  %v224_v13 = vmul.f32 %v578_v12, %v223_v11 }
  0xc0   : > { %vm964_vm0 = vmor %vm323_vm3, %vm371_vm4  ;;  %683 = vmatprep.subr.bf16.mxu0 %v732_v7  ;;  %vm340_vm3 = vcmp.eq.f32.partialorder %v299_v6, %v810_v26  ;;  %vm325_vm4 = vcmp.gt.f32.partialorder %v304_v2, %v810_v26 }
  0xc1   : > { %vm370_vm15 = vmand %vm338_vm8, %vm354_vm7  ;;  %vm324_vm7 = vcmp.gt.f32.partialorder %v299_v6, %v810_v26  ;;  %v393_v14 = vrot.slane %v224_v13, %v308_v23 }
  0xc2   : > { %vm373_vm10 = vmand %vm341_vm12, %vm357_vm11 }
  0xc3   : > { %vm684_vm14 = vmpackc.low %vm939_vm1, %vm957_vm13 }
  0xc4   : > { %vm386_vm9 = vmor %vm322_vm6, %vm370_vm15  ;;  %685 = vmatpush3.bf16.msk.msra.mxu0 %vm684_vm14, %v735_v44 }
  0xc5   : > { %vm372_vm8 = vmand %vm340_vm3, %vm356_vm2  ;;  %686 = vmatprep.subr.bf16.mxu0 %v732_v7  ;;  %vm505_vm2 = vcmask 1040384  }
  0xc6   : > { %vm389_vm11 = vmor %vm325_vm4, %vm373_vm10 }
  0xc7   : > { %vm687_vm12 = vmpackc.low %vm964_vm0, %vm386_vm9  ;;  %vm225_vm0 = vcmp.gt.f32.partialorder %v224_v13, 0.5 }
  0xc8   : > { %vm388_vm1 = vmor %vm324_vm7, %vm372_vm8  ;;  %688 = vmatpush3.bf16.msk.msra.mxu0 %vm687_vm12, %v735_v44 }
  0xc9   : > { %689 = vmatprep.subr.bf16.mxu0 %v732_v7  ;;  %vm690_vm13 = vmpackc.low %vm389_vm11, %vm388_vm1 }
  0xcc   : > { %691 = vmatpush3.bf16.msk.msra.mxu0 %vm690_vm13, %v735_v44 }
  0xcf   : > { %666 = vmatmul.mubr.f32.vlgmr.msra.gmra.mrb[0].mxu0 %v393_v14 }
 0x1a2   : > { %v492_v17 = vpop.f32.mrb[0].mxu0 }
 0x1a3   : > { %vm497_vm6 = vcmp.ge.f32.partialorder %v492_v17, %v496_v15  ;;  %vm500_vm15 = vcmp.lt.f32.partialorder %v492_v17, %v499_v16  ;;  %v667_v7 = vpop.f32.mrb[1].mxu0 }
 0x1a4   : > { %vm498_vm5 = vmand %vm225_vm0, %vm497_vm6 }
 0x1a5   : > { %vm501_vm10 = vmand %vm498_vm5, %vm500_vm15 }
 0x1a6   : > { %v612_v19 = vsel %vm501_vm10, 1.0, %v734_v18 }
 0x1a7   : > { %v504_v20 = vmul.f32 %v612_v19, %v804_v24 }
 0x1a9   : > { %v506_v21 = vsel %vm505_vm2, %v504_v20, 0.0 }
 0x1aa   : > { %507 = vadd.xlane.f32.xlu0 %v506_v21 }
 0x237   : > { %v508_v22 = vpop.xlane.xlu0 %507 }
 0x238   : > { %509 = vst [vmem:[%s163_s14] sm:$0x1] %v508_v22 }
 0x239 PF: > { %s19_s17 = sadd.s32 1, %s728_s17  }
 0x23a   : > { %p16_p10 = scmp.ge.s32.totalorder %s19_s17, 5  }
 0x23c   :  { %18 = sbr.rel (!%p16_p10) target bundleno = 16 (0x10), region = 61 }

</bundles_post_ra>
